<compile_context>
chip_gen: v7x
topology: tpu7x:2x2x1
jax: 0.10.0
libtpu: 0.0.40
codegen_flags: <defaults>
</compile_context>

<pallas_src>
import jax
import jax.numpy as jnp
import numpy as np
from jax.experimental import pallas as pl
from jax.experimental.pallas import tpu as pltpu


def attention_kernel(
    f2_ref,       # [B*L, F]  feature_out, batch-flattened
    h_ref,        # [B, D]    decoder hidden
    cvg_ref,      # [B, Cc]   gate * converge_vector
    w_enc_ref,    # [F, A]
    w_dec_ref,    # [D, A]
    w_conv_ref,   # [Cc, Cd]
    b_conv_ref,   # [1, Cd]   gate * b_conv
    w_catt_ref,   # [Cd, A]
    bias_ref,     # [1, A]    b_enc + b_dec + gate * b_catt (pre-folded)
    wf_ref,       # [1, A]    w_full reshaped to a row
    b_full_ref,   # [1, 1]    full_att bias (SMEM scalar)
    ctx_ref,      # [B, F]    output: context
    alpha_ref,    # [B, L]    output: attention weights
):
    B, L = alpha_ref.shape

    f2 = f2_ref[...]                                                  # [B*L, F]

    # One batch-flattened encoder projection on the MXU.
    att1 = jnp.dot(f2, w_enc_ref[...],
                   preferred_element_type=jnp.float32)                # [B*L, A]
    # Decoder / converge projections (converge operands already gated).
    att2 = jnp.dot(h_ref[...], w_dec_ref[...],
                   preferred_element_type=jnp.float32)                # [B, A]
    cv1 = jnp.dot(cvg_ref[...], w_conv_ref[...],
                  preferred_element_type=jnp.float32) + b_conv_ref[...]  # [B, Cd]
    att3 = jnp.dot(cv1, w_catt_ref[...],
                   preferred_element_type=jnp.float32)                # [B, A]

    per_batch = att2 + att3 + bias_ref[...]                           # [B, A]
    wf = wf_ref[...]                                                  # [1, A]
    b_full = b_full_ref[0, 0]                                         # scalar (SMEM)

    # Static unroll over the (small, static) batch: everything stays 2-D,
    # weights were touched exactly once above, zero grid/pipeline overhead.
    for b in range(B):
        lo = b * L
        pre = jnp.tanh(att1[lo:lo + L, :] + per_batch[b:b + 1, :])    # [L, A]
        # A -> 1 projection as VPU multiply + XLU lane reduce (no N=1 MXU op).
        att = jnp.sum(pre * wf, axis=-1, keepdims=True) + b_full      # [L, 1]
        # softmax over the L (sequence) axis
        m = jnp.max(att, axis=0, keepdims=True)
        e = jnp.exp(att - m)
        alpha = e / jnp.sum(e, axis=0, keepdims=True)                 # [L, 1]
        # context = sum_L feature_out * alpha
        ctx = jnp.sum(f2[lo:lo + L, :] * alpha, axis=0, keepdims=True)  # [1, F]
        ctx_ref[pl.ds(b, 1), :] = ctx
        # TODO(synk): the [L,1] -> [1,L] relayout below is a tiny XLU move; a
        # fully lane-major alpha would require transposed upstream matmuls,
        # which costs more than it saves at these sizes.
        alpha_ref[pl.ds(b, 1), :] = alpha.reshape(1, L)


def attention_forward(feature_out, decoder_hidden, converge_vector, params):
    B, L, F = feature_out.shape
    D = decoder_hidden.shape[1]
    Cc = converge_vector.shape[1]
    A = params["w_enc"].shape[1]
    Cd = params["w_conv"].shape[1]

    # PyTorch: `if sum(sum(converge_vector)).item() != 0:` — a global gate over
    # the whole batch.  Compute it here and fold it into the operands (exact).
    gate = (jnp.sum(converge_vector) != 0).astype(feature_out.dtype)

    f2 = feature_out.reshape(B * L, F)
    cv_gated = gate * converge_vector                                  # [B, Cc]
    b_conv_g = gate * params["b_conv"]                                 # [1, Cd]
    bias_row = params["b_enc"] + params["b_dec"] + gate * params["b_catt"]  # [1, A]
    wf_row = params["w_full"].reshape(1, A)                            # [1, A]
    b_full = params["b_full"].reshape(1, 1)

    flops = 2 * (B * L * F * A + B * D * A + B * Cc * Cd + B * Cd * A
                 + B * L * A + B * L * F)
    transcendentals = B * L * A + B * L
    bytes_accessed = 4 * (B * L * F + B * D + B * Cc + F * A + D * A
                          + Cc * Cd + Cd * A + 3 * A + 1 + B * F + B * L)

    vmem = lambda: pl.BlockSpec(memory_space=pltpu.MemorySpace.VMEM)   # noqa: E731
    smem = pl.BlockSpec(memory_space=pltpu.MemorySpace.SMEM)

    ctx, alpha = pl.pallas_call(
        attention_kernel,
        out_shape=(
            jax.ShapeDtypeStruct((B, F), jnp.float32),   # context
            jax.ShapeDtypeStruct((B, L), jnp.float32),   # alpha
        ),
        in_specs=[vmem() for _ in range(10)] + [smem],
        out_specs=(vmem(), vmem()),
        cost_estimate=pl.CostEstimate(
            flops=flops, transcendentals=transcendentals,
            bytes_accessed=bytes_accessed),
    )(
        f2, decoder_hidden, cv_gated,
        params["w_enc"], params["w_dec"],
        params["w_conv"], b_conv_g, params["w_catt"],
        bias_row, wf_row, b_full,
    )
    return ctx, alpha  # (context [B, F], alpha [B, L])


def reference_forward(feature_out, decoder_hidden, converge_vector, params):
    """Pure-JAX mirror of the PyTorch forward, for validation."""
    att1 = feature_out @ params["w_enc"] + params["b_enc"]           # [B,L,A]
    att2 = decoder_hidden @ params["w_dec"] + params["b_dec"]        # [B,A]
    cv = converge_vector @ params["w_conv"] + params["b_conv"]       # [B,Cd]
    att3 = cv @ params["w_catt"] + params["b_catt"]                  # [B,A]
    flag = jnp.where(jnp.sum(converge_vector) != 0.0, 1.0, 0.0)
    pre = jnp.tanh(att1 + att2[:, None, :] + flag * att3[:, None, :])
    att = (pre @ params["w_full"] + params["b_full"])[..., 0]        # [B,L]
    att = att - jnp.max(att, axis=1, keepdims=True)
    e = jnp.exp(att)
    alpha = e / jnp.sum(e, axis=1, keepdims=True)
    context = jnp.sum(feature_out * alpha[:, :, None], axis=1)
    return context, alpha


def init_params(key, F, D, Cc, Cd, A):
    ks = jax.random.split(key, 10)
    mk = lambda k, shp, fan_in: jax.random.uniform(                  # noqa: E731
        k, shp, jnp.float32, -1.0 / np.sqrt(fan_in), 1.0 / np.sqrt(fan_in))
    return {
        "w_enc": mk(ks[0], (F, A), F),  "b_enc": mk(ks[1], (1, A), F),
        "w_dec": mk(ks[2], (D, A), D),  "b_dec": mk(ks[3], (1, A), D),
        "w_conv": mk(ks[4], (Cc, Cd), Cc), "b_conv": mk(ks[5], (1, Cd), Cc),
        "w_catt": mk(ks[6], (Cd, A), Cd), "b_catt": mk(ks[7], (1, A), Cd),
        "w_full": mk(ks[8], (A, 1), A), "b_full": mk(ks[9], (1, 1), A),
    }


if __name__ == "__main__":
    # Small shapes consistent with the module:
    B, L = 2, 8            # batch, sequence length of the encoder features
    F = 32                 # feature_out dim
    D = 32                 # decoder_dim
    Cc, Cd = 16, 8         # converge_vector_channel, converge_vector_dim
    A = 256                # attention_dim

    key = jax.random.PRNGKey(0)
    k1, k2, k3, kp = jax.random.split(key, 4)

    feature = jax.random.normal(k1, (B, L, F), jnp.float32)
    hidden = jax.random.normal(k2, (B, D), jnp.float32)
    converge = jax.random.normal(k3, (B, Cc), jnp.float32)  # nonzero -> conv branch
    params = init_params(kp, F, D, Cc, Cd, A)

    ctx, alpha = attention_forward(feature, hidden, converge, params)
    jax.block_until_ready((ctx, alpha))

    ctx_ref, alpha_ref = reference_forward(feature, hidden, converge, params)
    np.testing.assert_allclose(np.asarray(ctx), np.asarray(ctx_ref),
                               rtol=1e-5, atol=1e-5)
    np.testing.assert_allclose(np.asarray(alpha), np.asarray(alpha_ref),
                               rtol=1e-5, atol=1e-5)

    # Also exercise the zero-converge branch (gate == 0).
    ctx0, alpha0 = attention_forward(feature, hidden, jnp.zeros_like(converge), params)
    jax.block_until_ready((ctx0, alpha0))
    ctx0_ref, alpha0_ref = reference_forward(feature, hidden,
                                             jnp.zeros_like(converge), params)
    np.testing.assert_allclose(np.asarray(ctx0), np.asarray(ctx0_ref),
                               rtol=1e-5, atol=1e-5)
    np.testing.assert_allclose(np.asarray(alpha0), np.asarray(alpha0_ref),
                               rtol=1e-5, atol=1e-5)

    print("KERNEL_OK")
</pallas_src>

<mosaic_0001>
module attributes {stable_mosaic.version = 11 : i64} {
  func.func @attention_kernel(%arg0: memref<16x32xf32, #tpu.memory_space<vmem>>, %arg1: memref<2x32xf32, #tpu.memory_space<vmem>>, %arg2: memref<2x16xf32, #tpu.memory_space<vmem>>, %arg3: memref<32x256xf32, #tpu.memory_space<vmem>>, %arg4: memref<32x256xf32, #tpu.memory_space<vmem>>, %arg5: memref<16x8xf32, #tpu.memory_space<vmem>>, %arg6: memref<1x8xf32, #tpu.memory_space<vmem>>, %arg7: memref<8x256xf32, #tpu.memory_space<vmem>>, %arg8: memref<1x256xf32, #tpu.memory_space<vmem>>, %arg9: memref<1x256xf32, #tpu.memory_space<vmem>>, %arg10: memref<1x1xf32, #tpu.memory_space<smem>>, %arg11: memref<2x32xf32, #tpu.memory_space<vmem>>, %arg12: memref<2x8xf32, #tpu.memory_space<vmem>>) attributes {dimension_semantics = [], scalar_prefetch = 0 : i64, scratch_operands = 0 : i64, tpu.core_type = #tpu.core_type<tc>} {
    %c0 = arith.constant 0 : index
    %c0_0 = arith.constant 0 : index
    %0 = vector.load %arg0[%c0, %c0_0] : memref<16x32xf32, #tpu.memory_space<vmem>>, vector<16x32xf32>
    %c0_1 = arith.constant 0 : index
    %c0_2 = arith.constant 0 : index
    %1 = vector.load %arg3[%c0_1, %c0_2] : memref<32x256xf32, #tpu.memory_space<vmem>>, vector<32x256xf32>
    %cst = arith.constant dense<0.000000e+00> : vector<16x256xf32>
    %2 = tpu.matmul %0, %1, %cst {dimension_numbers = #tpu.dot_dimension_numbers<[1], [0], [0], [1], [0, 0, 1, 1], [], []>} : vector<16x32xf32>, vector<32x256xf32>, vector<16x256xf32> -> vector<16x256xf32>
    %c0_3 = arith.constant 0 : index
    %c0_4 = arith.constant 0 : index
    %3 = vector.load %arg1[%c0_3, %c0_4] : memref<2x32xf32, #tpu.memory_space<vmem>>, vector<2x32xf32>
    %c0_5 = arith.constant 0 : index
    %c0_6 = arith.constant 0 : index
    %4 = vector.load %arg4[%c0_5, %c0_6] : memref<32x256xf32, #tpu.memory_space<vmem>>, vector<32x256xf32>
    %cst_7 = arith.constant dense<0.000000e+00> : vector<2x256xf32>
    %5 = tpu.matmul %3, %4, %cst_7 {dimension_numbers = #tpu.dot_dimension_numbers<[1], [0], [0], [1], [0, 0, 1, 1], [], []>} : vector<2x32xf32>, vector<32x256xf32>, vector<2x256xf32> -> vector<2x256xf32>
    %c0_8 = arith.constant 0 : index
    %c0_9 = arith.constant 0 : index
    %6 = vector.load %arg2[%c0_8, %c0_9] : memref<2x16xf32, #tpu.memory_space<vmem>>, vector<2x16xf32>
    %c0_10 = arith.constant 0 : index
    %c0_11 = arith.constant 0 : index
    %7 = vector.load %arg5[%c0_10, %c0_11] : memref<16x8xf32, #tpu.memory_space<vmem>>, vector<16x8xf32>
    %cst_12 = arith.constant dense<0.000000e+00> : vector<2x8xf32>
    %8 = tpu.matmul %6, %7, %cst_12 {dimension_numbers = #tpu.dot_dimension_numbers<[1], [0], [0], [1], [0, 0, 1, 1], [], []>} : vector<2x16xf32>, vector<16x8xf32>, vector<2x8xf32> -> vector<2x8xf32>
    %c0_13 = arith.constant 0 : index
    %c0_14 = arith.constant 0 : index
    %9 = vector.load %arg6[%c0_13, %c0_14] : memref<1x8xf32, #tpu.memory_space<vmem>>, vector<1x8xf32>
    %10 = vector.broadcast %9 : vector<1x8xf32> to vector<2x8xf32>
    %11 = arith.addf %8, %10 : vector<2x8xf32>
    %c0_15 = arith.constant 0 : index
    %c0_16 = arith.constant 0 : index
    %12 = vector.load %arg7[%c0_15, %c0_16] : memref<8x256xf32, #tpu.memory_space<vmem>>, vector<8x256xf32>
    %cst_17 = arith.constant dense<0.000000e+00> : vector<2x256xf32>
    %13 = tpu.matmul %11, %12, %cst_17 {dimension_numbers = #tpu.dot_dimension_numbers<[1], [0], [0], [1], [0, 0, 1, 1], [], []>} : vector<2x8xf32>, vector<8x256xf32>, vector<2x256xf32> -> vector<2x256xf32>
    %14 = arith.addf %5, %13 : vector<2x256xf32>
    %c0_18 = arith.constant 0 : index
    %c0_19 = arith.constant 0 : index
    %15 = vector.load %arg8[%c0_18, %c0_19] : memref<1x256xf32, #tpu.memory_space<vmem>>, vector<1x256xf32>
    %16 = vector.broadcast %15 : vector<1x256xf32> to vector<2x256xf32>
    %17 = arith.addf %14, %16 : vector<2x256xf32>
    %c0_20 = arith.constant 0 : index
    %c0_21 = arith.constant 0 : index
    %18 = vector.load %arg9[%c0_20, %c0_21] : memref<1x256xf32, #tpu.memory_space<vmem>>, vector<1x256xf32>
    %c0_22 = arith.constant 0 : index
    %c0_23 = arith.constant 0 : index
    %19 = memref.load %arg10[%c0_22, %c0_23] : memref<1x1xf32, #tpu.memory_space<smem>>
    %20 = vector.extract_strided_slice %2 {offsets = [0, 0], sizes = [8, 256], strides = [1, 1]} : vector<16x256xf32> to vector<8x256xf32>
    %21 = vector.extract_strided_slice %17 {offsets = [0, 0], sizes = [1, 256], strides = [1, 1]} : vector<2x256xf32> to vector<1x256xf32>
    %22 = vector.broadcast %21 : vector<1x256xf32> to vector<8x256xf32>
    %23 = arith.addf %20, %22 : vector<8x256xf32>
    %24 = math.tanh %23 : vector<8x256xf32>
    %25 = vector.broadcast %18 : vector<1x256xf32> to vector<8x256xf32>
    %26 = arith.mulf %24, %25 : vector<8x256xf32>
    %cst_24 = arith.constant dense<0.000000e+00> : vector<8xf32>
    %27 = vector.multi_reduction <add>, %26, %cst_24 [1] : vector<8x256xf32> to vector<8xf32>
    %28 = vector.shape_cast %27 : vector<8xf32> to vector<8x1xf32>
    %29 = vector.broadcast %19 : f32 to vector<8x1xf32>
    %30 = arith.addf %28, %29 : vector<8x1xf32>
    %cst_25 = arith.constant dense<0xFF800000> : vector<1xf32>
    %31 = vector.multi_reduction <maximumf>, %30, %cst_25 [0] : vector<8x1xf32> to vector<1xf32>
    %32 = vector.shape_cast %31 : vector<1xf32> to vector<1x1xf32>
    %33 = vector.broadcast %32 : vector<1x1xf32> to vector<8x1xf32>
    %34 = arith.subf %30, %33 : vector<8x1xf32>
    %35 = math.exp %34 : vector<8x1xf32>
    %cst_26 = arith.constant dense<0.000000e+00> : vector<1xf32>
    %36 = vector.multi_reduction <add>, %35, %cst_26 [0] : vector<8x1xf32> to vector<1xf32>
    %37 = vector.shape_cast %36 : vector<1xf32> to vector<1x1xf32>
    %38 = vector.broadcast %37 : vector<1x1xf32> to vector<8x1xf32>
    %39 = arith.divf %35, %38 : vector<8x1xf32>
    %40 = vector.extract_strided_slice %0 {offsets = [0, 0], sizes = [8, 32], strides = [1, 1]} : vector<16x32xf32> to vector<8x32xf32>
    %41 = vector.broadcast %39 : vector<8x1xf32> to vector<8x32xf32>
    %42 = arith.mulf %40, %41 : vector<8x32xf32>
    %cst_27 = arith.constant dense<0.000000e+00> : vector<32xf32>
    %43 = vector.multi_reduction <add>, %42, %cst_27 [0] : vector<8x32xf32> to vector<32xf32>
    %44 = vector.shape_cast %43 : vector<32xf32> to vector<1x32xf32>
    %c0_28 = arith.constant 0 : index
    %c0_29 = arith.constant 0 : index
    %45 = vector.load %arg11[%c0_28, %c0_29] : memref<2x32xf32, #tpu.memory_space<vmem>>, vector<1x32xf32>
    tpu.vector_store %arg11[%c0_28, %c0_29], %44 {strides = array<i32>} : memref<2x32xf32, #tpu.memory_space<vmem>>, vector<1x32xf32>,
    %46 = vector.shape_cast %39 : vector<8x1xf32> to vector<1x8xf32>
    %c0_30 = arith.constant 0 : index
    %c0_31 = arith.constant 0 : index
    %47 = vector.load %arg12[%c0_30, %c0_31] : memref<2x8xf32, #tpu.memory_space<vmem>>, vector<1x8xf32>
    tpu.vector_store %arg12[%c0_30, %c0_31], %46 {strides = array<i32>} : memref<2x8xf32, #tpu.memory_space<vmem>>, vector<1x8xf32>,
    %48 = vector.extract_strided_slice %2 {offsets = [8, 0], sizes = [8, 256], strides = [1, 1]} : vector<16x256xf32> to vector<8x256xf32>
    %49 = vector.extract_strided_slice %17 {offsets = [1, 0], sizes = [1, 256], strides = [1, 1]} : vector<2x256xf32> to vector<1x256xf32>
    %50 = vector.broadcast %49 : vector<1x256xf32> to vector<8x256xf32>
    %51 = arith.addf %48, %50 : vector<8x256xf32>
    %52 = math.tanh %51 : vector<8x256xf32>
    %53 = vector.broadcast %18 : vector<1x256xf32> to vector<8x256xf32>
    %54 = arith.mulf %52, %53 : vector<8x256xf32>
    %cst_32 = arith.constant dense<0.000000e+00> : vector<8xf32>
    %55 = vector.multi_reduction <add>, %54, %cst_32 [1] : vector<8x256xf32> to vector<8xf32>
    %56 = vector.shape_cast %55 : vector<8xf32> to vector<8x1xf32>
    %57 = vector.broadcast %19 : f32 to vector<8x1xf32>
    %58 = arith.addf %56, %57 : vector<8x1xf32>
    %cst_33 = arith.constant dense<0xFF800000> : vector<1xf32>
    %59 = vector.multi_reduction <maximumf>, %58, %cst_33 [0] : vector<8x1xf32> to vector<1xf32>
    %60 = vector.shape_cast %59 : vector<1xf32> to vector<1x1xf32>
    %61 = vector.broadcast %60 : vector<1x1xf32> to vector<8x1xf32>
    %62 = arith.subf %58, %61 : vector<8x1xf32>
    %63 = math.exp %62 : vector<8x1xf32>
    %cst_34 = arith.constant dense<0.000000e+00> : vector<1xf32>
    %64 = vector.multi_reduction <add>, %63, %cst_34 [0] : vector<8x1xf32> to vector<1xf32>
    %65 = vector.shape_cast %64 : vector<1xf32> to vector<1x1xf32>
    %66 = vector.broadcast %65 : vector<1x1xf32> to vector<8x1xf32>
    %67 = arith.divf %63, %66 : vector<8x1xf32>
    %68 = vector.extract_strided_slice %0 {offsets = [8, 0], sizes = [8, 32], strides = [1, 1]} : vector<16x32xf32> to vector<8x32xf32>
    %69 = vector.broadcast %67 : vector<8x1xf32> to vector<8x32xf32>
    %70 = arith.mulf %68, %69 : vector<8x32xf32>
    %cst_35 = arith.constant dense<0.000000e+00> : vector<32xf32>
    %71 = vector.multi_reduction <add>, %70, %cst_35 [0] : vector<8x32xf32> to vector<32xf32>
    %72 = vector.shape_cast %71 : vector<32xf32> to vector<1x32xf32>
    %c1 = arith.constant 1 : index
    %c0_36 = arith.constant 0 : index
    %73 = vector.load %arg11[%c1, %c0_36] : memref<2x32xf32, #tpu.memory_space<vmem>>, vector<1x32xf32>
    tpu.vector_store %arg11[%c1, %c0_36], %72 {strides = array<i32>} : memref<2x32xf32, #tpu.memory_space<vmem>>, vector<1x32xf32>,
    %74 = vector.shape_cast %67 : vector<8x1xf32> to vector<1x8xf32>
    %c1_37 = arith.constant 1 : index
    %c0_38 = arith.constant 0 : index
    %75 = vector.load %arg12[%c1_37, %c0_38] : memref<2x8xf32, #tpu.memory_space<vmem>>, vector<1x8xf32>
    tpu.vector_store %arg12[%c1_37, %c0_38], %74 {strides = array<i32>} : memref<2x8xf32, #tpu.memory_space<vmem>>, vector<1x8xf32>,
    return
  }
}

</mosaic_0001>

<bundles_post_ra>
// kernel: tpu_custom_call.1
= control target key start
LH: loop header
LB: loop body
LE: loop exit
PB: predicated region body
PF: predicated region fallthrough
CT: control target
= control target key end

     0   :  { %19 = vsyncpa [#allocation4], 0  ;;  %s959_s0 = inlined_call_operand.vmem [shape: f32[16,32], index: 0, kind: input, shape index: {}]   ;;  %s960_s1 = inlined_call_operand.vmem [shape: f32[2,32], index: 1, kind: input, shape index: {}]   ;;  %s961_s2 = inlined_call_operand.hbm [shape: f32[2,16], index: 2, kind: input, shape index: {}]   ;;  %s962_s3 = inlined_call_operand.hbm [shape: f32[32,256], index: 3, kind: input, shape index: {}]   ;;  %s963_s4 = inlined_call_operand.hbm [shape: f32[32,256], index: 4, kind: input, shape index: {}]   ;;  %s964_s5 = inlined_call_operand.vmem [shape: f32[16,8], index: 5, kind: input, shape index: {}]   ;;  %s965_s6 = inlined_call_operand.vmem [shape: f32[1,8], index: 6, kind: input, shape index: {}]   ;;  %s966_s7 = inlined_call_operand.vmem [shape: f32[8,256], index: 7, kind: input, shape index: {}]   ;;  %s967_s8 = inlined_call_operand.vmem [shape: f32[1,256], index: 8, kind: input, shape index: {}]   ;;  %s968_s9 = inlined_call_operand.vmem [shape: f32[1,256], index: 9, kind: input, shape index: {}]   ;;  %s969_s10 = inlined_call_operand.<no memory space> [shape: f32[1,1], index: 10, kind: input, shape index: {}]   ;;  %s970_s11 = inlined_call_operand.hbm [shape: f32[2,32], index: 11, kind: output, shape index: {0}]   ;;  %s971_s12 = inlined_call_operand.hbm [shape: f32[2,8], index: 12, kind: output, shape index: {1}]  }
   0x1   :  { %20 = vsyncpa [#allocation7], 0 }
   0x2   :  { %21 = vsyncpa [#allocation5], 0 }
   0x3   :  { %22 = vsyncpa [#allocation11], 0  ;;  %s765_s21 = smov [#allocation6]   ;;  %s647_s25 = scalar_lea.hbm %s962_s3, 1024 }
   0x4   :  { %s42_s22 = sshll.u32 %s765_s21, 4  ;;  %p648_p0 = scmp.ne.s32.totalorder %s962_s3, %s647_s25  ;;  %s43_s22 = int_to_ptr.vmem [resolvable:$true] %s42_s22 }
   0x5   :  { %p651_p1 = scmp.lt.u32.totalorder %s647_s25, %s962_s3 }
   0x7   :  { %p653_p2 = pnand %p651_p1, %p648_p0 }
   0x9   :  { %656 = shalt.err (!%p653_p2)
}
   0xa   :  { %s657_s30 = scalar_lea.vmem %s43_s22, 1024  ;;  %p662_p4 = scmp.lt.s32.totalorder %s43_s22, %s43_s22 }
   0xb   :  { %p658_p3 = scmp.ne.s32.totalorder %s43_s22, %s657_s30  ;;  %p663_p5 = scmp.lt.s32.totalorder %s657_s30, %s657_s30 }
   0xd   :  { %p664_p6 = por %p663_p5, %p662_p4 }
   0xf   :  { %p665_p7 = pnand %p664_p6, %p658_p3 }
  0x11   :  { %668 = shalt.err (!%p665_p7)
}
  0x12   :  { %s766_s13 = smov 256   ;;  %s767_s14 = smov 16  }
  0x13   :  { %48 = dma.hbm_to_vmem [thread:$0]  %s962_s3, 1024, %s43_s22, [#allocation7], %s766_s13, %s766_s13, %s767_s14  }
  0x14   :  { %s768_s17 = smov [#allocation3]   ;;  %s769_s19 = smov [#allocation8]  }
  0x15   :  { %s33_s18 = sshll.u32 %s768_s17, 4  ;;  %s54_s20 = sshll.u32 %s769_s19, 4  ;;  %s34_s18 = int_to_ptr.vmem [resolvable:$true] %s33_s18  ;;  %s55_s20 = int_to_ptr.vmem [resolvable:$true] %s54_s20 }
  0x16   :  { %s669_s24 = scalar_lea.hbm %s961_s2, 32 }
  0x17   :  { %p670_p8 = scmp.ne.s32.totalorder %s961_s2, %s669_s24  ;;  %p673_p9 = scmp.lt.u32.totalorder %s669_s24, %s961_s2 }
  0x19   :  { %p675_p10 = pnand %p673_p9, %p670_p8 }
  0x1b   :  { %678 = shalt.err (!%p675_p10)
}
  0x1c   :  { %s679_s3 = scalar_lea.vmem %s34_s18, 32  ;;  %p684_p12 = scmp.lt.s32.totalorder %s34_s18, %s34_s18 }
  0x1d   :  { %p680_p11 = scmp.ne.s32.totalorder %s34_s18, %s679_s3  ;;  %p685_p13 = scmp.lt.s32.totalorder %s679_s3, %s679_s3 }
  0x1f   :  { %p686_p0 = por %p685_p13, %p684_p12 }
  0x21   :  { %p687_p1 = pnand %p686_p0, %p680_p11 }
  0x23   :  { %690 = shalt.err (!%p687_p1)
}
  0x24   :  { %36 = dma.hbm_to_vmem [thread:$0]  %s961_s2, 32, %s34_s18, [#allocation4]  }
  0x25   :  { %s691_s16 = scalar_lea.hbm %s963_s4, 1024 }
  0x26   :  { %p692_p2 = scmp.ne.s32.totalorder %s963_s4, %s691_s16  ;;  %p695_p3 = scmp.lt.u32.totalorder %s691_s16, %s963_s4 }
  0x28   :  { %p697_p4 = pnand %p695_p3, %p692_p2 }
  0x2a   :  { %700 = shalt.err (!%p697_p4)
}
  0x2b   :  { %s701_s24 = scalar_lea.vmem %s55_s20, 1024  ;;  %p706_p6 = scmp.lt.s32.totalorder %s55_s20, %s55_s20 }
  0x2c   :  { %p702_p5 = scmp.ne.s32.totalorder %s55_s20, %s701_s24  ;;  %p707_p7 = scmp.lt.s32.totalorder %s701_s24, %s701_s24 }
  0x2e   :  { %p708_p8 = por %p707_p7, %p706_p6 }
  0x30   :  { %p709_p9 = pnand %p708_p8, %p702_p5 }
  0x32   :  { %712 = shalt.err (!%p709_p9)
}
  0x33   :  { %60 = dma.hbm_to_vmem [thread:$0]  %s963_s4, 1024, %s55_s20, [#allocation7], %s766_s13, %s766_s13, %s767_s14  }
  0x34   :  { %757 = dma.done.wait [#allocation4], 32  }
  0x35   :  { %758 = vsyncadd [#allocation4], 4294967264 }
  0x36   :  { %759 = dma.done.wait [#allocation7], 2048  }
  0x37   :  { %760 = vsyncadd [#allocation7], 4294965248  ;;  %v770_v0 = vmov 0.0|0.0   ;;  %vm771_vm0 = vmmov 0   ;;  %v772_v1 = vmov 0.0   ;;  %v186_v2 = vld [vmem:[%s964_s5] sm:$0xff]  ;;  %v422_v43 = vlaneseq }
  0x38   :  { %608 = vmatprep.subr.bf16.mxu1 %v770_v0  ;;  %597 = vmatprep.mubr.msk.f32.mxu1 %vm771_vm0, %v772_v1  ;;  %v187_v3 = vld [vmem:[%s964_s5 + $0x8] sm:$0xff]  ;;  %v185_v6 = vld [vmem:[#allocation3] sm:$0x3]  ;;  %vm195_vm1 = vcmask 130048   ;;  %v86_v15 = vld [vmem:[#allocation6 + $0x10] sm:$0xff]  ;;  %vm92_vm2 = vcmask 261120  }
  0x39   :  { %163 = vmatprep.mubr.f32.mxu0 %v772_v1  ;;  %v609_v4 = vpack.c.bf16 %v187_v3, %v186_v2  ;;  %v270_v5 = vld [vmem:[%s966_s7 + $0x8] sm:$0xff]  ;;  %v269_v7 = vld [vmem:[%s966_s7] sm:$0xff]  ;;  %v90_v21 = vld [vmem:[#allocation6 + $0x30] sm:$0xff]  ;;  %vm271_vm3 = vcmask 64512   ;;  %v916_v44 = vshrl.u32 %v422_v43, 7  ;;  %vm501_vm4 = vcmask 57344  }
  0x3a   :  { %v178_v8 = vld [vmem:[#allocation8 + $0x8] sm:$0xff]  ;;  %v180_v9 = vld [vmem:[#allocation8 + $0x18] sm:$0xff]  ;;  %v84_v14 = vld [vmem:[#allocation6] sm:$0xff] }
  0x3b   :  { %610 = vmatpush3.bf16.msra.mxu1 %v609_v4  ;;  %v85_v10 = vld [vmem:[#allocation6 + $0x8] sm:$0xff]  ;;  %v611_v11 = vpack.c.bf16 %v180_v9, %v178_v8  ;;  %v87_v12 = vld [vmem:[#allocation6 + $0x18] sm:$0xff]  ;;  %v602_v16 = vpack.c.bf16 %v86_v15, %v84_v14  ;;  %v88_v20 = vld [vmem:[#allocation6 + $0x20] sm:$0xff]  ;;  %v424_v45 = vsub.s32 0, %v916_v44  ;;  %v428_v47 = vsub.s32 1, %v916_v44 }
  0x3c   :  { %275 = vmatprep.subr.mxu1 %v270_v5  ;;  %v600_v13 = vpack.c.bf16 %v87_v12, %v85_v10  ;;  %v89_v17 = vld [vmem:[#allocation6 + $0x28] sm:$0xff]  ;;  %v91_v18 = vld [vmem:[#allocation6 + $0x38] sm:$0xff]  ;;  %v606_v22 = vpack.c.bf16 %v90_v21, %v88_v20  ;;  %v177_v25 = vld [vmem:[#allocation8] sm:$0xff] }
  0x3d   :  { %v604_v19 = vpack.c.bf16 %v91_v18, %v89_v17  ;;  %v897_v23 = vld [vmem:[%s959_s0] sm:$0xff]  ;;  %v904_v24 = vld [vmem:[%s959_s0 + $0x8] sm:$0xff]  ;;  %v179_v26 = vld [vmem:[#allocation8 + $0x10] sm:$0xff] }
  0x3e   :  { %598 = vmatmul.mubr.msk.f32.vlgmr.msra.gmra.mrb[0].mxu1 %vm195_vm1, %v185_v6  ;;  %601 = vmatprep.subr.bf16.mxu0 %v600_v13  ;;  %v586_v27 = vld [vmem:[%s965_s6] ss:$0 sm:$0xff]  ;;  %v182_v28 = vld [vmem:[#allocation8 + $0x28] sm:$0xff]  ;;  %v613_v31 = vpack.c.bf16 %v179_v26, %v177_v25  ;;  %v181_v35 = vld [vmem:[#allocation8 + $0x20] sm:$0xff] }
  0x3f   :  { %276 = vmatpush1.msra.mxu1 %v269_v7  ;;  %339 = vmatprep.mubr.f32.mxu1 %v772_v1  ;;  %v184_v29 = vld [vmem:[#allocation8 + $0x38] sm:$0xff]  ;;  %v183_v36 = vld [vmem:[#allocation8 + $0x30] sm:$0xff] }
  0x40   :  { %612 = vmatprep.subr.bf16.mxu1 %v611_v11  ;;  %603 = vmatpush1.bf16.msra.mxu0 %v602_v16  ;;  %v615_v34 = vpack.c.bf16 %v184_v29, %v182_v28  ;;  %v617_v37 = vpack.c.bf16 %v183_v36, %v181_v35  ;;  %v176_v38 = vld [vmem:[%s960_s1] sm:$0x3]  ;;  %v464_v11 = vstv %s969_s10 }
  0x41   :  { %605 = vmatprep.subr.bf16.mxu0 %v604_v19  ;;  %v420_v46 = vld [vmem:[%s967_s8] sm:$0x3] }
  0x42   :  { %v425_v48 = vrot.slane %v420_v46, %v424_v45  ;;  %v429_v49 = vrot.slane %v420_v46, %v428_v47  ;;  %v434_v62 = vld [vmem:[%s968_s9] sm:$0x3]  ;;  %s773_s9 = smov [#allocation10]  }
  0x43   :  { %v452_v63 = vrot.slane %v434_v62, %v424_v45  ;;  %v456_v0 = vrot.slane %v434_v62, %v428_v47  ;;  %s570_s10 = sshll.u32 %s773_s9, 4  ;;  %s571_s10 = int_to_ptr.vmem [resolvable:$true] %s570_s10 }
  0x44   :  { %607 = vmatpush1.bf16.msra.mxu0 %v606_v22  ;;  %s713_s21 = scalar_lea.vmem %s571_s10, 32  ;;  %p718_p11 = scmp.lt.s32.totalorder %s571_s10, %s571_s10 }
  0x45   :  { %p714_p10 = scmp.ne.s32.totalorder %s571_s10, %s713_s21  ;;  %p719_p12 = scmp.lt.s32.totalorder %s713_s21, %s713_s21 }
  0x47   :  { %584 = vmatmul.mubr.msk.f32.vlgmr.msra.gmra.mrb[0].mxu0 %vm92_vm2, %v897_v23  ;;  %p720_p13 = por %p719_p12, %p718_p11 }
  0x48   :  { %169 = vmatprep.mubr.f32.mxu0 %v772_v1 }
  0x49   :  { %p721_p0 = pnand %p720_p13, %p714_p10 }
  0x4b   :  { %585 = vmatmul.mubr.msk.f32.gmra.mrb[2].mxu0 %vm92_vm2, %v904_v24 }
 0x111   :  { %v265_v30 = vpop.f32.mrb[0].mxu1 }
 0x112   :  { %v266_v32 = vadd.f32 %v586_v27, %v265_v30  ;;  %v599_v33 = vpop.f32.mrb[1].mxu1 }
 0x114   :  { %588 = vmatmul.mubr.msk.f32.vlgmr.msra.gmra.mrb[2].mxu1 %vm271_vm3, %v266_v32 }
 0x115   :  { %614 = vmatpush1.bf16.msra.mxu1 %v613_v31  ;;  %413 = vmatprep.mubr.f32.mxu1 %v772_v1 }
 0x116   :  { %616 = vmatprep.subr.bf16.mxu1 %v615_v34 }
 0x119   :  { %618 = vmatpush1.bf16.msra.mxu1 %v617_v37 }
 0x11a   :  { %v165_v39 = vpop.f32.mrb[0].mxu0 }
 0x11b   :  { %v167_v40 = vpop.f32.mrb[1].mxu0 }
 0x11c   :  { %589 = vmatmul.mubr.msk.f32.vlgmr.msra.gmra.mrb[2].mxu1 %vm92_vm2, %v176_v38 }
 0x11e   :  { %v171_v41 = vpop.f32.mrb[2].mxu0 }
 0x11f   :  { %v173_v42 = vpop.f32.mrb[3].mxu0 }
 0x1ef   :  { %v415_v50 = vpop.f32.mrb[2].mxu1 }
 0x1f0   :  { %v432_v51 = vadd.f32 %v425_v48, %v415_v50  ;;  %v417_v52 = vpop.f32.mrb[3].mxu1  ;;  %v495_v50 = vand.u32 127, %v422_v43 }
 0x1f1   :  { %v433_v53 = vadd.f32 %v429_v49, %v417_v52 }
 0x1f2   :  { %v439_v54 = vrot.slane %v432_v51, %v424_v45  ;;  %v506_v55 = vrot.slane %v432_v51, %v428_v47  ;;  %v498_v51 = vsub.s32 %v495_v50, %v916_v44 }
 0x1f3   :  { %v443_v56 = vrot.slane %v433_v53, %v424_v45  ;;  %v510_v57 = vrot.slane %v433_v53, %v428_v47 }
 0x1f4   :  { %v444_v58 = vadd.f32 %v439_v54, %v165_v39  ;;  %v511_v59 = vadd.f32 %v506_v55, %v171_v41 }
 0x1f5   :  { %v445_v60 = vadd.f32 %v443_v56, %v167_v40  ;;  %v512_v61 = vadd.f32 %v510_v57, %v173_v42 }
 0x1f6   :  { %631 = vtanh.f32 %v444_v58 }
 0x1f7   :  { %633 = vtanh.f32 %v445_v60 }
 0x1f8   :  { %635 = vtanh.f32 %v511_v59 }
 0x1f9   :  { %637 = vtanh.f32 %v512_v61 }
 0x200   :  { %v632_v1 = vpop.eup %631 }
 0x201   :  { %v634_v2 = vpop.eup %633  ;;  %v459_v3 = vmul.f32 %v632_v1, %v452_v63 }
 0x202   :  { %v636_v4 = vpop.eup %635  ;;  %v460_v5 = vmul.f32 %v634_v2, %v456_v0 }
 0x203   :  { %v638_v6 = vpop.eup %637  ;;  %v515_v7 = vmul.f32 %v636_v4, %v452_v63 }
 0x204   :  { %v461_v8 = vadd.f32 %v460_v5, %v459_v3  ;;  %v516_v9 = vmul.f32 %v638_v6, %v456_v0 }
 0x206   :  { %462 = vadd.xlane.f32.xlu0 %v461_v8  ;;  %v517_v10 = vadd.f32 %v516_v9, %v515_v7 }
 0x20a   :  { %518 = vadd.xlane.f32.xlu0 %v517_v10 }
 0x293   :  { %v463_v12 = vpop.xlane.xlu0 %462 }
 0x294   :  { %v465_v13 = vadd.f32 %v464_v11, %v463_v12 }
 0x296   :  { %v466_v14 = vrot.slane %v465_v13, 4 }
 0x297   :  { %v519_v15 = vpop.xlane.xlu0 %518 }
 0x298   :  { %v467_v16 = vmax.f32 %v465_v13, %v466_v14  ;;  %v520_v17 = vadd.f32 %v519_v15, %v464_v11 }
 0x29a   :  { %v468_v18 = vrot.slane %v467_v16, 2  ;;  %v521_v19 = vrot.slane %v520_v17, 4 }
 0x29c   :  { %v469_v20 = vmax.f32 %v467_v16, %v468_v18  ;;  %v522_v21 = vmax.f32 %v520_v17, %v521_v19 }
 0x29e   :  { %v470_v22 = vrot.slane %v469_v20, 1  ;;  %v523_v25 = vrot.slane %v522_v21, 2 }
 0x2a0   :  { %v471_v26 = vmax.f32 %v469_v20, %v470_v22  ;;  %v524_v27 = vmax.f32 %v522_v21, %v523_v25 }
 0x2a2   :  { %v472_v28 = vsub.f32 %v465_v13, %v471_v26  ;;  %v525_v29 = vrot.slane %v524_v27, 1 }
 0x2a4   :  { %v473_v30 = vmul.f32 1.442695, %v472_v28  ;;  %v526_v31 = vmax.f32 %v524_v27, %v525_v29 }
 0x2a6   :  { %639 = vpow2.f32 %v473_v30  ;;  %v527_v32 = vsub.f32 %v520_v17, %v526_v31 }
 0x2a8   :  { %v528_v33 = vmul.f32 1.442695, %v527_v32 }
 0x2aa   :  { %641 = vpow2.f32 %v528_v33 }
 0x2b0   :  { %v640_v34 = vpop.eup %639 }
 0x2b1   :  { %v475_v35 = vrot.slane %v640_v34, 4 }
 0x2b3   :  { %v476_v36 = vadd.f32 %v640_v34, %v475_v35 }
 0x2b4   :  { %v642_v37 = vpop.eup %641 }
 0x2b5   :  { %v530_v38 = vrot.slane %v642_v37, 4  ;;  %v477_v39 = vrot.slane %v476_v36, 2 }
 0x2b7   :  { %v531_v40 = vadd.f32 %v642_v37, %v530_v38  ;;  %v478_v41 = vadd.f32 %v477_v39, %v476_v36 }
 0x2b9   :  { %v479_v42 = vrot.slane %v478_v41, 1  ;;  %v532_v45 = vrot.slane %v531_v40, 2 }
 0x2bb   :  { %v480_v46 = vadd.f32 %v479_v42, %v478_v41  ;;  %v533_v47 = vadd.f32 %v532_v45, %v531_v40 }
 0x2bd   :  { %643 = vrcp.f32 %v480_v46  ;;  %v534_v48 = vrot.slane %v533_v47, 1 }
 0x2bf   :  { %v535_v49 = vadd.f32 %v534_v48, %v533_v47 }
 0x2c1   :  { %645 = vrcp.f32 %v535_v49 }
 0x2c7   :  { %v644_v52 = vpop.eup %643 }
 0x2c8   :  { %v482_v53 = vmul.f32 %v644_v52, %v640_v34 }
 0x2ca   :  { %v483_v54 = vmul.f32 %v482_v53, %v897_v23  ;;  %v499_v55 = vrot.slane %v482_v53, %v498_v51 }
 0x2cb   :  { %v646_v56 = vpop.eup %645 }
 0x2cc   :  { %v484_v57 = vsel %vm92_vm2, %v483_v54, 0.0  ;;  %v537_v58 = vmul.f32 %v646_v56, %v642_v37  ;;  %502 = vst.msk [vmem:[#allocation10] sm:$0x1] %vm501_vm4, %v499_v55 }
 0x2cd   :  { %v485_v59 = vrot.slane %v484_v57, 4 }
 0x2ce   :  { %v538_v60 = vmul.f32 %v537_v58, %v904_v24  ;;  %v551_v61 = vrot.slane %v537_v58, %v498_v51 }
 0x2cf   :  { %v486_v43 = vadd.f32 %v485_v59, %v484_v57 }
 0x2d0   :  { %v539_v44 = vsel %vm92_vm2, %v538_v60, 0.0  ;;  %553 = vst.msk [vmem:[#allocation10 + $0x1] sm:$0x1] %vm501_vm4, %v551_v61 }
 0x2d1   :  { %v487_v62 = vrot.slane %v486_v43, 2  ;;  %v540_v63 = vrot.slane %v539_v44, 4 }
 0x2d2   :  { %724 = shalt.err (!%p721_p0)
}
 0x2d3   :  { %s725_s2 = scalar_lea.hbm %s971_s12, 32 }
 0x2d4   :  { %p726_p1 = scmp.ne.s32.totalorder %s971_s12, %s725_s2  ;;  %p729_p2 = scmp.lt.u32.totalorder %s725_s2, %s971_s12 }
 0x2d6   :  { %p731_p3 = pnand %p729_p2, %p726_p1 }
 0x2d8   :  { %734 = shalt.err (!%p731_p3)
}
 0x2d9   :  { %573 = dma.vmem_to_hbm [thread:$0]  %s571_s10, 32, %s971_s12, [#allocation11]   ;;  %v488_v23 = vadd.f32 %v487_v62, %v486_v43  ;;  %v541_v24 = vadd.f32 %v540_v63, %v539_v44  ;;  %vm491_vm5 = vcmask 253952  }
 0x2da   :  { %s774_s13 = smov [#allocation9]  }
 0x2db   :  { %v489_v0 = vrot.slane %v488_v23, 1  ;;  %v542_v1 = vrot.slane %v541_v24, 2  ;;  %s560_s14 = sshll.u32 %s774_s13, 4  ;;  %s561_s14 = int_to_ptr.vmem [resolvable:$true] %s560_s14 }
 0x2dc   :  { %s735_s20 = scalar_lea.vmem %s561_s14, 32  ;;  %p740_p5 = scmp.lt.s32.totalorder %s561_s14, %s561_s14 }
 0x2dd   :  { %v490_v2 = vadd.f32 %v489_v0, %v488_v23  ;;  %v543_v3 = vadd.f32 %v542_v1, %v541_v24  ;;  %p736_p4 = scmp.ne.s32.totalorder %s561_s14, %s735_s20  ;;  %p741_p6 = scmp.lt.s32.totalorder %s735_s20, %s735_s20 }
 0x2df   :  { %492 = vst.msk [vmem:[#allocation9] sm:$0x1] %vm491_vm5, %v490_v2  ;;  %v544_v4 = vrot.slane %v543_v3, 1  ;;  %p742_p7 = por %p741_p6, %p740_p5 }
 0x2e1   :  { %v545_v5 = vadd.f32 %v544_v4, %v543_v3  ;;  %p743_p8 = pnand %p742_p7, %p736_p4 }
 0x2e3   :  { %546 = vst.msk [vmem:[#allocation9 + $0x1] sm:$0x1] %vm491_vm5, %v545_v5 }
 0x2e4   :  { %746 = shalt.err (!%p743_p8)
}
 0x2e5   :  { %s747_s7 = scalar_lea.hbm %s970_s11, 32 }
 0x2e6   :  { %p748_p9 = scmp.ne.s32.totalorder %s970_s11, %s747_s7  ;;  %p751_p10 = scmp.lt.u32.totalorder %s747_s7, %s970_s11 }
 0x2e8   :  { %p753_p11 = pnand %p751_p10, %p748_p9 }
 0x2ea   :  { %756 = shalt.err (!%p753_p11)
}
 0x2eb   :  { %563 = dma.vmem_to_hbm [thread:$0]  %s561_s14, 32, %s970_s11, [#allocation5]  }
 0x2ec   :  { %761 = dma.done.wait [#allocation5], 32  }
 0x2ed   :  { %762 = vsyncadd [#allocation5], 4294967264 }
 0x2ee   :  { %763 = dma.done.wait [#allocation11], 32  }
 0x2ef   :  { %764 = vsyncadd [#allocation11], 4294967264 }
 0x2f0   :  { %580 = vsyncpa [#allocation4], 1 }
 0x2f1   :  { %581 = vsyncpa [#allocation7], 1 }
 0x2f2   :  { %582 = vsyncpa [#allocation5], 1 }
 0x2f3   :  { %583 = vsyncpa [#allocation11], 1 }

</bundles_post_ra>
